<compile_context>
chip_gen: v6e
topology: v6e:2x2x1
jax: 0.10.0
libtpu: 0.0.40
codegen_flags: <defaults>
</compile_context>

<pallas_src>
import functools

import numpy as np
import jax
import jax.numpy as jnp
from jax import lax
from jax.experimental import pallas as pl
from jax.experimental.pallas import tpu as pltpu


# ----------------------------- Pallas kernels ------------------------------

def _stem_kernel(cols_ref, w_ref, s_ref, b_ref, pool_ref, o_ref):
    """Fused: 7x7 conv (im2col matmul) + BN + ReLU + 3x3/s2/p1 maxpool.
    Grid is over the batch; cols_ref holds one image's patch matrix."""
    f32 = jnp.float32
    y = jnp.dot(cols_ref[0], w_ref[...], preferred_element_type=f32)
    y = jnp.maximum(y * s_ref[...] + b_ref[...], 0.0)              # (OH*OW, 64)
    # maxpool via 0/1 row-selection matmuls + running max.  Out-of-bounds taps
    # select nothing (zero rows); post-ReLU activations are >= 0 so 0 == -inf here.
    m = jnp.dot(pool_ref[0], y, preferred_element_type=f32)
    for t in range(1, pool_ref.shape[0]):
        m = jnp.maximum(m, jnp.dot(pool_ref[t], y, preferred_element_type=f32))
    o_ref[0] = m.astype(o_ref.dtype)


def _bottleneck_kernel(x_ref, t2_ref, w1_ref, s1_ref, b1_ref,
                       w2_ref, s2_ref, b2_ref, w3_ref, s3_ref, b3_ref,
                       *rest, stride, has_down):
    """Whole ResNet bottleneck block fused into one kernel (per-image grid step):
       relu(bn(conv1 1x1)) -> relu(bn(conv2 3x3, stride)) -> bn(conv3 1x1)
       + identity / bn(downsample 1x1, stride) -> relu.
    conv2's spatial shift / stride / zero padding is folded into the 9 precomputed
    0/1 row-selection matrices in t2_ref, so every intermediate stays in VMEM."""
    if has_down:
        wd_ref, sd_ref, bd_ref, o_ref = rest
    else:
        (o_ref,) = rest
    f32 = jnp.float32
    x = x_ref[0]                                                   # (R_in, Cin)

    y1 = jnp.dot(x, w1_ref[...], preferred_element_type=f32)
    y1 = jnp.maximum(y1 * s1_ref[...] + b1_ref[...], 0.0)          # (R_in, P)

    n_tap = t2_ref.shape[0]
    acc = jnp.zeros((t2_ref.shape[1], w2_ref.shape[2]), f32)       # (R_out, P)
    for t in range(n_tap):
        sel = jnp.dot(t2_ref[t], y1, preferred_element_type=f32)
        acc = acc + jnp.dot(sel, w2_ref[t], preferred_element_type=f32)
    y2 = jnp.maximum(acc * s2_ref[...] + b2_ref[...], 0.0)         # (R_out, P)

    y3 = jnp.dot(y2, w3_ref[...], preferred_element_type=f32)
    y3 = y3 * s3_ref[...] + b3_ref[...]                            # (R_out, 4P)

    if has_down:
        xd = x if stride == 1 else jnp.dot(t2_ref[n_tap // 2], x,
                                           preferred_element_type=f32)
        idn = (jnp.dot(xd, wd_ref[...], preferred_element_type=f32)
               * sd_ref[...] + bd_ref[...])
    else:
        idn = x                                                    # Cin == 4P, stride == 1
    o_ref[0] = jnp.maximum(y3 + idn, 0.0).astype(o_ref.dtype)


def _tail_kernel(img_ref, emb_ref, wih_ref, whh_ref, bl_ref, feat_ref,
                 wi_ref, wl_ref, wf_ref, cb_ref, o_ref, *, seq_len, hidden, batch):
    """Fused tail: MAC global max-pool + squeeze, LSTM (hoisted input projection,
    statically unrolled, PyTorch i,f,g,o gate order) + mean over time, concat and
    Linear(569, 1) as a VPU multiply + lane reduction."""
    f32 = jnp.float32
    # MaxPool2d(S/8, stride=1) over the whole (S/8 x S/8) map == global spatial max.
    v = img_ref[...]                                               # (B, S_sp, 512)
    mac = v[:, 0, :]
    for s in range(1, v.shape[1]):
        mac = jnp.maximum(mac, v[:, s, :])                         # (B, 512)

    # LSTM: x-projection for ALL timesteps in one matmul (hoisted out of recurrence).
    xp = jnp.dot(emb_ref[...], wih_ref[...], preferred_element_type=f32) + bl_ref[...]
    h = jnp.zeros((batch, hidden), f32)
    c = jnp.zeros((batch, hidden), f32)
    acc = jnp.zeros((batch, hidden), f32)
    for t in range(seq_len):                                       # static unroll (T small)
        g = (xp[t * batch:(t + 1) * batch, :]
             + jnp.dot(h, whh_ref[...], preferred_element_type=f32))
        ig = jax.nn.sigmoid(g[:, 0 * hidden:1 * hidden])
        fg = jax.nn.sigmoid(g[:, 1 * hidden:2 * hidden])
        gg = jnp.tanh(g[:, 2 * hidden:3 * hidden])
        og = jax.nn.sigmoid(g[:, 3 * hidden:4 * hidden])
        c = fg * c + ig * gg
        h = og * jnp.tanh(c)
        acc = acc + h
    mean_h = acc * (1.0 / seq_len)                                 # (B, H)

    # concat((mac, mean_h, feature)) @ W.T + b, done piecewise as VPU mul + lane-sum.
    logit = (jnp.sum(mac * wi_ref[...], axis=1, keepdims=True)
             + jnp.sum(mean_h * wl_ref[...], axis=1, keepdims=True)
             + jnp.sum(feat_ref[...] * wf_ref[...], axis=1, keepdims=True)
             + cb_ref[...])
    o_ref[...] = logit.astype(o_ref.dtype)


# ------------------------------- spec helpers --------------------------------

def _bcast_spec(shape):
    """Same (whole-array) block at every grid step: weights / constants."""
    nd = len(shape)
    return pl.BlockSpec(tuple(shape), lambda n: (0,) * nd)


def _per_image_spec(shape):
    """(N, R, C) array blocked one image at a time."""
    return pl.BlockSpec((1,) + tuple(shape[1:]), lambda n: (n, 0, 0))


def _conv_tap_selectors(h, w, k, stride, pad):
    """0/1 selection matrices folding a KxK window's spatial shift / stride / zero
    padding into matmuls: sel[t, r_out, r_in] = 1 iff input row r_in is tap t of
    output row r_out's receptive field (all-zero row when the tap lies in padding)."""
    oh = (h + 2 * pad - k) // stride + 1
    ow = (w + 2 * pad - k) // stride + 1
    sel = np.zeros((k * k, oh * ow, h * w), np.float32)
    for di in range(k):
        for dj in range(k):
            t = di * k + dj
            for oi in range(oh):
                ii = oi * stride + di - pad
                if ii < 0 or ii >= h:
                    continue
                for oj in range(ow):
                    jj = oj * stride + dj - pad
                    if jj < 0 or jj >= w:
                        continue
                    sel[t, oi * ow + oj, ii * w + jj] = 1.0
    return jnp.asarray(sel), oh, ow


def _im2col(x, kh, kw, stride, pad):
    """x: (N,H,W,C) NHWC -> (N, OH*OW, KH*KW*C) patch matrix (rows ordered oh, ow)."""
    n, h, w, c = x.shape
    xp = jnp.pad(x, ((0, 0), (pad, pad), (pad, pad), (0, 0)))
    oh = (h + 2 * pad - kh) // stride + 1
    ow = (w + 2 * pad - kw) // stride + 1
    cols = []
    for i in range(kh):
        for j in range(kw):
            cols.append(lax.slice(
                xp, (0, i, j, 0),
                (n, i + (oh - 1) * stride + 1, j + (ow - 1) * stride + 1, c),
                (1, stride, stride, 1)))
    patches = jnp.stack(cols, axis=3)                  # (N, OH, OW, KH*KW, C)
    return patches.reshape(n, oh * ow, kh * kw * c), oh, ow


# ------------------------------- wrappers -----------------------------------

def stem_pallas(img_nhwc, p):
    """conv7x7/s2/p3 + BN + ReLU + maxpool3x3/s2/p1, fused into one kernel (grid over batch)."""
    n = img_nhwc.shape[0]
    cols, oh, ow = _im2col(img_nhwc, 7, 7, 2, 3)                   # (N, OH*OW, 147)
    pool_sel, ph, pw = _conv_tap_selectors(oh, ow, 3, 2, 1)        # (9, PH*PW, OH*OW)
    cout = p['w'].shape[1]
    args = [cols, p['w'], p['scale'], p['bias'], pool_sel]
    flops = 2 * n * (oh * ow * p['w'].shape[0] * cout
                     + pool_sel.shape[0] * ph * pw * oh * ow * cout)
    nbytes = 4 * (sum(int(np.prod(a.shape)) for a in args) + n * ph * pw * cout)
    out = pl.pallas_call(
        _stem_kernel,
        out_shape=jax.ShapeDtypeStruct((n, ph * pw, cout), jnp.float32),
        grid=(n,),
        in_specs=[_per_image_spec(cols.shape)] + [_bcast_spec(a.shape) for a in args[1:]],
        out_specs=_per_image_spec((n, ph * pw, cout)),
        compiler_params=pltpu.CompilerParams(dimension_semantics=("parallel",)),
        cost_estimate=pl.CostEstimate(flops=int(flops), transcendentals=0,
                                      bytes_accessed=int(nbytes)),
    )(*args)
    return out, (ph, pw)


def bottleneck_pallas(x, p, hw):
    """One fused pallas_call per bottleneck block; grid over the batch dimension."""
    n, r_in, cin = x.shape
    h_sp, w_sp = hw
    stride = p['stride']
    t2, oh, ow = _conv_tap_selectors(h_sp, w_sp, 3, stride, 1)     # (9, R_out, R_in)
    r_out = oh * ow
    planes = p['conv1']['w'].shape[1]
    cout = p['conv3']['w'].shape[1]
    has_down = 'downsample' in p

    args = [x, t2,
            p['conv1']['w'], p['conv1']['scale'], p['conv1']['bias'],
            p['conv2']['w'], p['conv2']['scale'], p['conv2']['bias'],
            p['conv3']['w'], p['conv3']['scale'], p['conv3']['bias']]
    if has_down:
        args += [p['downsample']['w'], p['downsample']['scale'], p['downsample']['bias']]

    flops = 2 * n * (r_in * cin * planes
                     + 9 * (r_out * r_in * planes + r_out * planes * planes)
                     + r_out * planes * cout)
    if has_down:
        flops += 2 * n * r_out * cin * cout
        if stride != 1:
            flops += 2 * n * r_out * r_in * cin
    nbytes = 4 * (sum(int(np.prod(a.shape)) for a in args) + n * r_out * cout)

    out = pl.pallas_call(
        functools.partial(_bottleneck_kernel, stride=stride, has_down=has_down),
        out_shape=jax.ShapeDtypeStruct((n, r_out, cout), jnp.float32),
        grid=(n,),
        in_specs=[_per_image_spec(x.shape)] + [_bcast_spec(a.shape) for a in args[1:]],
        out_specs=_per_image_spec((n, r_out, cout)),
        compiler_params=pltpu.CompilerParams(dimension_semantics=("parallel",)),
        cost_estimate=pl.CostEstimate(flops=int(flops), transcendentals=0,
                                      bytes_accessed=int(nbytes)),
    )(*args)
    return out, (oh, ow)


def tail_pallas(feat_img, embeds_flat, feature, params, *, seq_len, hidden):
    """MAC pool + squeeze + LSTM + mean + concat + Linear(569,1), one kernel."""
    batch = embeds_flat.shape[0] // seq_len
    lstm = params['lstm']
    cw = params['cls_w']                                           # (1, 569)
    n_img = feat_img.shape[2]
    w_img = cw[:, :n_img]
    w_lstm = cw[:, n_img:n_img + hidden]
    w_feat = cw[:, n_img + hidden:]
    vmem = pl.BlockSpec(memory_space=pltpu.MemorySpace.VMEM)
    args = [feat_img, embeds_flat, lstm['w_ih_t'], lstm['w_hh_t'], lstm['b'],
            feature, w_img, w_lstm, w_feat, params['cls_b']]
    return pl.pallas_call(
        functools.partial(_tail_kernel, seq_len=seq_len, hidden=hidden, batch=batch),
        out_shape=jax.ShapeDtypeStruct((batch, 1), jnp.float32),
        in_specs=[vmem] * len(args),
        out_specs=vmem,
    )(*args)


# --------------------------- parameter synthesis -----------------------------

def _make_conv_bn_raw(key, cin, cout, k):
    k1, k2, k3, k4, k5 = jax.random.split(key, 5)
    fan_in = cin * k * k
    w = jax.random.normal(k1, (cout, cin, k, k), jnp.float32) * (2.0 / fan_in) ** 0.5
    gamma = 1.0 + 0.1 * jax.random.normal(k2, (cout,), jnp.float32)
    beta = 0.1 * jax.random.normal(k3, (cout,), jnp.float32)
    running_mean = 0.1 * jax.random.normal(k4, (cout,), jnp.float32)
    running_var = 1.0 + 0.1 * jax.random.uniform(k5, (cout,), jnp.float32)
    eps = 1e-5
    scale = gamma / jnp.sqrt(running_var + eps)   # eval-mode BN folded into conv epilogue
    bias = beta - running_mean * scale
    return w, scale.reshape(1, cout), bias.reshape(1, cout)


def _conv1x1_params(key, cin, cout):
    w, s, b = _make_conv_bn_raw(key, cin, cout, 1)
    return {'w': jnp.transpose(w[:, :, 0, 0], (1, 0)), 'scale': s, 'bias': b}


def _conv3x3_params(key, cin, cout):
    w, s, b = _make_conv_bn_raw(key, cin, cout, 3)
    w_taps = jnp.transpose(w, (2, 3, 1, 0)).reshape(9, cin, cout)   # tap t = di*3+dj
    return {'w': w_taps, 'scale': s, 'bias': b}


def _stem_params(key, cin, cout, k):
    w, s, b = _make_conv_bn_raw(key, cin, cout, k)
    wmat = jnp.transpose(w, (2, 3, 1, 0)).reshape(k * k * cin, cout)  # im2col order
    return {'w': wmat, 'scale': s, 'bias': b}


def _make_bottleneck_params(key, cin, planes, stride, downsample):
    ks = jax.random.split(key, 4)
    p = {'stride': stride,
         'conv1': _conv1x1_params(ks[0], cin, planes),
         'conv2': _conv3x3_params(ks[1], planes, planes),
         'conv3': _conv1x1_params(ks[2], planes, planes * 4)}
    if downsample:
        p['downsample'] = _conv1x1_params(ks[3], cin, planes * 4)
    return p


def make_params(key, hidden_dim, emb_matrix):
    ks = jax.random.split(key, 14)
    stem = _stem_params(ks[0], 3, 64, 7)
    layer1 = [_make_bottleneck_params(ks[1], 64, 64, 1, True),
              _make_bottleneck_params(ks[2], 256, 64, 1, False),
              _make_bottleneck_params(ks[3], 256, 64, 1, False)]
    layer2 = [_make_bottleneck_params(ks[4], 256, 128, 2, True),
              _make_bottleneck_params(ks[5], 512, 128, 1, False),
              _make_bottleneck_params(ks[6], 512, 128, 1, False),
              _make_bottleneck_params(ks[7], 512, 128, 1, False)]
    emb_dim = emb_matrix.shape[1]
    s = 1.0 / np.sqrt(hidden_dim)
    w_ih = jax.random.uniform(ks[8], (4 * hidden_dim, emb_dim), jnp.float32, -s, s)
    w_hh = jax.random.uniform(ks[9], (4 * hidden_dim, hidden_dim), jnp.float32, -s, s)
    b_ih = jax.random.uniform(ks[10], (4 * hidden_dim,), jnp.float32, -s, s)
    b_hh = jax.random.uniform(ks[11], (4 * hidden_dim,), jnp.float32, -s, s)
    sc = 1.0 / np.sqrt(569.0)
    cls_w = jax.random.uniform(ks[12], (1, 569), jnp.float32, -sc, sc)
    cls_b = jax.random.uniform(ks[13], (1,), jnp.float32, -sc, sc)
    return {
        'stem': stem, 'layer1': layer1, 'layer2': layer2,
        'emb_matrix': emb_matrix,
        'lstm': {'w_ih_t': w_ih.T, 'w_hh_t': w_hh.T,
                 'b': (b_ih + b_hh).reshape(1, 4 * hidden_dim)},
        'cls_w': cls_w, 'cls_b': cls_b.reshape(1, 1),
    }


# ------------------------------ forward pass ---------------------------------

def housing_price_forward(params, x, *, input_size, hidden_dim):
    image, sentence, feature = x          # image NCHW, sentence (B,T) int32, feature (B,F)
    img = jnp.transpose(image, (0, 2, 3, 1)).astype(jnp.float32)   # NCHW -> NHWC

    # resnet50 children[:-4]: conv1+bn1+relu+maxpool fused in one kernel ...
    h, hw = stem_pallas(img, params['stem'])
    # ... then layer1 + layer2: one fused kernel per bottleneck block.
    for blk in params['layer1'] + params['layer2']:
        h, hw = bottleneck_pallas(h, blk, hw)                      # (B, (S/8)^2, 512)

    # MaxPool2d(input_size//8, stride=1) over exactly that spatial extent == global max,
    # handled inside the fused tail kernel.
    assert hw == (input_size // 8, input_size // 8)

    # word embedding lookup (gather) kept as XLA glue.
    # TODO(synk): the embedding gather could be a manual DMA-gather Pallas kernel.
    embeds = jnp.take(params['emb_matrix'], sentence, axis=0)      # (B, T, E)
    seq_len = sentence.shape[1]
    emb_dim = params['emb_matrix'].shape[1]
    # torch `.view(sentence.shape[1], -1, emb_dim)` is a row-major regroup, so the flat
    # (B*T, E) matrix is exactly what the kernel needs (it slices T blocks of B rows).
    embeds_flat = embeds.reshape(-1, emb_dim)                      # (T*B, E)

    # MAC maxpool + squeeze + LSTM + mean + concat + Linear(569, 1), all fused.
    return tail_pallas(h, embeds_flat, feature.astype(jnp.float32), params,
                       seq_len=seq_len, hidden=hidden_dim)


# ---------------------------------- main -------------------------------------

if __name__ == "__main__":
    key = jax.random.PRNGKey(0)

    input_size = 16          # image H = W
    hidden_dim = 32
    vocab_size = 50
    embedding_dim = 16
    feature_dim = 569 - 512 - hidden_dim      # classifier input is 569 = 512 + H + F
    batch = 2
    seq_len = 8

    k_emb, k_par, k_img, k_sent, k_feat = jax.random.split(key, 5)
    emb_matrix = jax.random.normal(k_emb, (vocab_size, embedding_dim), jnp.float32)
    params = make_params(k_par, hidden_dim, emb_matrix)

    image = jax.random.normal(k_img, (batch, 3, input_size, input_size), jnp.float32)
    sentence = jax.random.randint(k_sent, (batch, seq_len), 0, vocab_size, dtype=jnp.int32)
    feature = jax.random.normal(k_feat, (batch, feature_dim), jnp.float32)

    out = housing_price_forward(params, (image, sentence, feature),
                                input_size=input_size, hidden_dim=hidden_dim)
    out = jax.block_until_ready(out)
    assert out.shape == (batch, 1), out.shape
    assert bool(jnp.all(jnp.isfinite(out)))
    print("KERNEL_OK")
</pallas_src>

<mosaic_0001>
module attributes {stable_mosaic.version = 11 : i64} {
  func.func @_stem_kernel(%arg0: i32, %arg1: memref<1x64x147xf32, #tpu.memory_space<vmem>>, %arg2: memref<147x64xf32, #tpu.memory_space<vmem>>, %arg3: memref<1x64xf32, #tpu.memory_space<vmem>>, %arg4: memref<1x64xf32, #tpu.memory_space<vmem>>, %arg5: memref<9x16x64xf32, #tpu.memory_space<vmem>>, %arg6: memref<1x16x64xf32, #tpu.memory_space<vmem>>) attributes {dimension_semantics = [#tpu.dimension_semantics<parallel>], iteration_bounds = array<i64: 2>, scalar_prefetch = 0 : i64, scratch_operands = 0 : i64, tpu.core_type = #tpu.core_type<tc>, window_params = [{transform_indices = @transform_0, window_bounds = array<i64: 1, 64, 147>}, {pipeline_mode = #tpu.pipeline_mode<synchronous>, transform_indices = @transform_1, window_bounds = array<i64: 147, 64>}, {pipeline_mode = #tpu.pipeline_mode<synchronous>, transform_indices = @transform_2, window_bounds = array<i64: 1, 64>}, {pipeline_mode = #tpu.pipeline_mode<synchronous>, transform_indices = @transform_3, window_bounds = array<i64: 1, 64>}, {pipeline_mode = #tpu.pipeline_mode<synchronous>, transform_indices = @transform_4, window_bounds = array<i64: 9, 16, 64>}, {transform_indices = @transform_5, window_bounds = array<i64: 1, 16, 64>}]} {
    %c0 = arith.constant 0 : index
    %c0_0 = arith.constant 0 : index
    %c0_1 = arith.constant 0 : index
    %0 = vector.load %arg1[%c0, %c0_0, %c0_1] : memref<1x64x147xf32, #tpu.memory_space<vmem>>, vector<1x64x147xf32>
    %1 = vector.shape_cast %0 : vector<1x64x147xf32> to vector<64x147xf32>
    %c0_2 = arith.constant 0 : index
    %c0_3 = arith.constant 0 : index
    %2 = vector.load %arg2[%c0_2, %c0_3] : memref<147x64xf32, #tpu.memory_space<vmem>>, vector<147x64xf32>
    %cst = arith.constant dense<0.000000e+00> : vector<64x64xf32>
    %3 = tpu.matmul %1, %2, %cst {dimension_numbers = #tpu.dot_dimension_numbers<[1], [0], [0], [1], [0, 0, 1, 1], [], []>} : vector<64x147xf32>, vector<147x64xf32>, vector<64x64xf32> -> vector<64x64xf32>
    %c0_4 = arith.constant 0 : index
    %c0_5 = arith.constant 0 : index
    %4 = vector.load %arg3[%c0_4, %c0_5] : memref<1x64xf32, #tpu.memory_space<vmem>>, vector<1x64xf32>
    %5 = vector.broadcast %4 : vector<1x64xf32> to vector<64x64xf32>
    %6 = arith.mulf %3, %5 : vector<64x64xf32>
    %c0_6 = arith.constant 0 : index
    %c0_7 = arith.constant 0 : index
    %7 = vector.load %arg4[%c0_6, %c0_7] : memref<1x64xf32, #tpu.memory_space<vmem>>, vector<1x64xf32>
    %8 = vector.broadcast %7 : vector<1x64xf32> to vector<64x64xf32>
    %9 = arith.addf %6, %8 : vector<64x64xf32>
    %cst_8 = arith.constant 0.000000e+00 : f32
    %10 = vector.broadcast %cst_8 : f32 to vector<64x64xf32>
    %11 = arith.maximumf %9, %10 : vector<64x64xf32>
    %c0_9 = arith.constant 0 : index
    %c0_10 = arith.constant 0 : index
    %c0_11 = arith.constant 0 : index
    %12 = vector.load %arg5[%c0_9, %c0_10, %c0_11] : memref<9x16x64xf32, #tpu.memory_space<vmem>>, vector<1x16x64xf32>
    %13 = vector.shape_cast %12 : vector<1x16x64xf32> to vector<16x64xf32>
    %cst_12 = arith.constant dense<0.000000e+00> : vector<16x64xf32>
    %14 = tpu.matmul %13, %11, %cst_12 {dimension_numbers = #tpu.dot_dimension_numbers<[1], [0], [0], [1], [0, 0, 1, 1], [], []>} : vector<16x64xf32>, vector<64x64xf32>, vector<16x64xf32> -> vector<16x64xf32>
    %c1 = arith.constant 1 : index
    %c0_13 = arith.constant 0 : index
    %c0_14 = arith.constant 0 : index
    %15 = vector.load %arg5[%c1, %c0_13, %c0_14] : memref<9x16x64xf32, #tpu.memory_space<vmem>>, vector<1x16x64xf32>
    %16 = vector.shape_cast %15 : vector<1x16x64xf32> to vector<16x64xf32>
    %cst_15 = arith.constant dense<0.000000e+00> : vector<16x64xf32>
    %17 = tpu.matmul %16, %11, %cst_15 {dimension_numbers = #tpu.dot_dimension_numbers<[1], [0], [0], [1], [0, 0, 1, 1], [], []>} : vector<16x64xf32>, vector<64x64xf32>, vector<16x64xf32> -> vector<16x64xf32>
    %18 = arith.maximumf %14, %17 : vector<16x64xf32>
    %c2 = arith.constant 2 : index
    %c0_16 = arith.constant 0 : index
    %c0_17 = arith.constant 0 : index
    %19 = vector.load %arg5[%c2, %c0_16, %c0_17] : memref<9x16x64xf32, #tpu.memory_space<vmem>>, vector<1x16x64xf32>
    %20 = vector.shape_cast %19 : vector<1x16x64xf32> to vector<16x64xf32>
    %cst_18 = arith.constant dense<0.000000e+00> : vector<16x64xf32>
    %21 = tpu.matmul %20, %11, %cst_18 {dimension_numbers = #tpu.dot_dimension_numbers<[1], [0], [0], [1], [0, 0, 1, 1], [], []>} : vector<16x64xf32>, vector<64x64xf32>, vector<16x64xf32> -> vector<16x64xf32>
    %22 = arith.maximumf %18, %21 : vector<16x64xf32>
    %c3 = arith.constant 3 : index
    %c0_19 = arith.constant 0 : index
    %c0_20 = arith.constant 0 : index
    %23 = vector.load %arg5[%c3, %c0_19, %c0_20] : memref<9x16x64xf32, #tpu.memory_space<vmem>>, vector<1x16x64xf32>
    %24 = vector.shape_cast %23 : vector<1x16x64xf32> to vector<16x64xf32>
    %cst_21 = arith.constant dense<0.000000e+00> : vector<16x64xf32>
    %25 = tpu.matmul %24, %11, %cst_21 {dimension_numbers = #tpu.dot_dimension_numbers<[1], [0], [0], [1], [0, 0, 1, 1], [], []>} : vector<16x64xf32>, vector<64x64xf32>, vector<16x64xf32> -> vector<16x64xf32>
    %26 = arith.maximumf %22, %25 : vector<16x64xf32>
    %c4 = arith.constant 4 : index
    %c0_22 = arith.constant 0 : index
    %c0_23 = arith.constant 0 : index
    %27 = vector.load %arg5[%c4, %c0_22, %c0_23] : memref<9x16x64xf32, #tpu.memory_space<vmem>>, vector<1x16x64xf32>
    %28 = vector.shape_cast %27 : vector<1x16x64xf32> to vector<16x64xf32>
    %cst_24 = arith.constant dense<0.000000e+00> : vector<16x64xf32>
    %29 = tpu.matmul %28, %11, %cst_24 {dimension_numbers = #tpu.dot_dimension_numbers<[1], [0], [0], [1], [0, 0, 1, 1], [], []>} : vector<16x64xf32>, vector<64x64xf32>, vector<16x64xf32> -> vector<16x64xf32>
    %30 = arith.maximumf %26, %29 : vector<16x64xf32>
    %c5 = arith.constant 5 : index
    %c0_25 = arith.constant 0 : index
    %c0_26 = arith.constant 0 : index
    %31 = vector.load %arg5[%c5, %c0_25, %c0_26] : memref<9x16x64xf32, #tpu.memory_space<vmem>>, vector<1x16x64xf32>
    %32 = vector.shape_cast %31 : vector<1x16x64xf32> to vector<16x64xf32>
    %cst_27 = arith.constant dense<0.000000e+00> : vector<16x64xf32>
    %33 = tpu.matmul %32, %11, %cst_27 {dimension_numbers = #tpu.dot_dimension_numbers<[1], [0], [0], [1], [0, 0, 1, 1], [], []>} : vector<16x64xf32>, vector<64x64xf32>, vector<16x64xf32> -> vector<16x64xf32>
    %34 = arith.maximumf %30, %33 : vector<16x64xf32>
    %c6 = arith.constant 6 : index
    %c0_28 = arith.constant 0 : index
    %c0_29 = arith.constant 0 : index
    %35 = vector.load %arg5[%c6, %c0_28, %c0_29] : memref<9x16x64xf32, #tpu.memory_space<vmem>>, vector<1x16x64xf32>
    %36 = vector.shape_cast %35 : vector<1x16x64xf32> to vector<16x64xf32>
    %cst_30 = arith.constant dense<0.000000e+00> : vector<16x64xf32>
    %37 = tpu.matmul %36, %11, %cst_30 {dimension_numbers = #tpu.dot_dimension_numbers<[1], [0], [0], [1], [0, 0, 1, 1], [], []>} : vector<16x64xf32>, vector<64x64xf32>, vector<16x64xf32> -> vector<16x64xf32>
    %38 = arith.maximumf %34, %37 : vector<16x64xf32>
    %c7 = arith.constant 7 : index
    %c0_31 = arith.constant 0 : index
    %c0_32 = arith.constant 0 : index
    %39 = vector.load %arg5[%c7, %c0_31, %c0_32] : memref<9x16x64xf32, #tpu.memory_space<vmem>>, vector<1x16x64xf32>
    %40 = vector.shape_cast %39 : vector<1x16x64xf32> to vector<16x64xf32>
    %cst_33 = arith.constant dense<0.000000e+00> : vector<16x64xf32>
    %41 = tpu.matmul %40, %11, %cst_33 {dimension_numbers = #tpu.dot_dimension_numbers<[1], [0], [0], [1], [0, 0, 1, 1], [], []>} : vector<16x64xf32>, vector<64x64xf32>, vector<16x64xf32> -> vector<16x64xf32>
    %42 = arith.maximumf %38, %41 : vector<16x64xf32>
    %c8 = arith.constant 8 : index
    %c0_34 = arith.constant 0 : index
    %c0_35 = arith.constant 0 : index
    %43 = vector.load %arg5[%c8, %c0_34, %c0_35] : memref<9x16x64xf32, #tpu.memory_space<vmem>>, vector<1x16x64xf32>
    %44 = vector.shape_cast %43 : vector<1x16x64xf32> to vector<16x64xf32>
    %cst_36 = arith.constant dense<0.000000e+00> : vector<16x64xf32>
    %45 = tpu.matmul %44, %11, %cst_36 {dimension_numbers = #tpu.dot_dimension_numbers<[1], [0], [0], [1], [0, 0, 1, 1], [], []>} : vector<16x64xf32>, vector<64x64xf32>, vector<16x64xf32> -> vector<16x64xf32>
    %46 = arith.maximumf %42, %45 : vector<16x64xf32>
    %c0_37 = arith.constant 0 : index
    %c0_38 = arith.constant 0 : index
    %c0_39 = arith.constant 0 : index
    %47 = vector.load %arg6[%c0_37, %c0_38, %c0_39] : memref<1x16x64xf32, #tpu.memory_space<vmem>>, vector<1x16x64xf32>
    %48 = vector.shape_cast %47 : vector<1x16x64xf32> to vector<16x64xf32>
    %49 = vector.shape_cast %46 : vector<16x64xf32> to vector<1x16x64xf32>
    tpu.vector_store %arg6[%c0_37, %c0_38, %c0_39], %49 {strides = array<i32>} : memref<1x16x64xf32, #tpu.memory_space<vmem>>, vector<1x16x64xf32>,
    return
  }
  func.func @transform_0(%arg0: i32) -> (i32, i32, i32) {
    %c0_i32 = arith.constant 0 : i32
    %c0_i32_0 = arith.constant 0 : i32
    %c0_i32_1 = arith.constant 0 : i32
    return %arg0, %c0_i32, %c0_i32_0 : i32, i32, i32
  }
  func.func @transform_1(%arg0: i32) -> (i32, i32) {
    %c0_i32 = arith.constant 0 : i32
    %c0_i32_0 = arith.constant 0 : i32
    %c0_i32_1 = arith.constant 0 : i32
    return %c0_i32, %c0_i32_0 : i32, i32
  }
  func.func @transform_2(%arg0: i32) -> (i32, i32) {
    %c0_i32 = arith.constant 0 : i32
    %c0_i32_0 = arith.constant 0 : i32
    %c0_i32_1 = arith.constant 0 : i32
    return %c0_i32, %c0_i32_0 : i32, i32
  }
  func.func @transform_3(%arg0: i32) -> (i32, i32) {
    %c0_i32 = arith.constant 0 : i32
    %c0_i32_0 = arith.constant 0 : i32
    %c0_i32_1 = arith.constant 0 : i32
    return %c0_i32, %c0_i32_0 : i32, i32
  }
  func.func @transform_4(%arg0: i32) -> (i32, i32, i32) {
    %c0_i32 = arith.constant 0 : i32
    %c0_i32_0 = arith.constant 0 : i32
    %c0_i32_1 = arith.constant 0 : i32
    %c0_i32_2 = arith.constant 0 : i32
    return %c0_i32, %c0_i32_0, %c0_i32_1 : i32, i32, i32
  }
  func.func @transform_5(%arg0: i32) -> (i32, i32, i32) {
    %c0_i32 = arith.constant 0 : i32
    %c0_i32_0 = arith.constant 0 : i32
    %c0_i32_1 = arith.constant 0 : i32
    return %arg0, %c0_i32, %c0_i32_0 : i32, i32, i32
  }
}

</mosaic_0001>

<bundles_post_ra>
// kernel: tpu_custom_call.1
= control target key start
LH: loop header
LB: loop body
LE: loop exit
PB: predicated region body
PF: predicated region fallthrough
CT: control target
= control target key end

     0   :  { %10 = vsyncpa [#allocation3], 0  ;;  %s2205_s0 = inlined_call_operand.vmem [shape: f32[2,64,147], index: 0, kind: input, shape index: {}]   ;;  %s2206_s1 = inlined_call_operand.vmem [shape: f32[147,64], index: 1, kind: input, shape index: {}]   ;;  %s2207_s2 = inlined_call_operand.vmem [shape: f32[1,64], index: 2, kind: input, shape index: {}]   ;;  %s2208_s3 = inlined_call_operand.vmem [shape: f32[1,64], index: 3, kind: input, shape index: {}]   ;;  %s2209_s4 = inlined_call_operand.hbm [shape: f32[9,16,64], index: 4, kind: input, shape index: {}]   ;;  %s2210_s5 = inlined_call_operand.hbm [shape: f32[2,16,64], index: 5, kind: output, shape index: {}]  }
   0x1   :  { %11 = vsyncpa [#allocation4], 0 }
   0x2   :  { %13 = vsyncpa [#allocation4 + $0x1], 0  ;;  %s1797_s18 = smov 0   ;;  %s1799_s19 = smov 0  }
   0x3   :  { %s1801_s20 = smov 0   ;;  %s1803_s21 = smov 0  }
   0x4 LB: > { %s1818_s22 = sadd.s32 4294967295, %s1758_s21   ;;  %s1307_s23 = sadd.s32 4294967294, %s1758_s21   ;;  %s1758_s21 = sphi %s1803_s21, %s2218_s21   ;;  %s1754_s20 = sphi %s1801_s20, %s2217_s20   ;;  %s1750_s19 = sphi %s1799_s19, %s2216_s19   ;;  %s1746_s18 = sphi %s1797_s18, %s2215_s18  }
   0x5   : > { %s1822_s24 = sadd.s32 1, %s1758_s21   ;;  %s136_s25 = sadd.s32 1, %s1754_s20 }
   0x6   : > { %s133_s26 = ssub.s32 %s1758_s21, %s1822_s24  ;;  %p146_p0 = scmp.ne.s32.totalorder %s1754_s20, %s1750_s19 }
   0x7   : > { %p134_p1 = scmp.eq.s32.totalorder %s133_s26, 0  ;;  %p147_p2 = scmp.eq.s32.totalorder %s1818_s22, 1 }
   0x8   : > { %p152_p3 = scmp.ne.s32.totalorder %s1750_s19, %s1746_s18  ;;  %p153_p4 = scmp.eq.s32.totalorder %s1307_s23, 1 }
   0x9   : > { %s1833_s27 = scalar_select %p134_p1, %s1754_s20, %s136_s25  }
   0xa   : > { %p1835_p5 = por %p147_p2, %p146_p0  ;;  %p1839_p6 = por %p153_p4, %p152_p3 }
   0xb   : > { %p1308_p7 = scmp.ge.s32.totalorder %s1758_s21, 1  ;;  %p160_p8 = scmp.lt.s32.totalorder %s1758_s21, 3 }
   0xc   : > { %s2212_s29 = scalar_select %p1839_p6, 1, 0 }
   0xd   : > { %p1627_p9 = scmp.eq.s32.totalorder %s1818_s22, 0  ;;  %p1846_p10 = pnand %p1308_p7, %p160_p8 }
   0xe   : > { %s1760_s6 = smov [#allocation2]  }
   0xf   : > { %s181_s7 = sshll.u32 %s1760_s6, 4  ;;  %p1619_p11 = pneg %p1846_p10  ;;  %s182_s7 = int_to_ptr.vmem [resolvable:$true] %s181_s7 }
  0x10   : > { %s1679_s8 = scalar_lea.vmem %s182_s7, 2304  ;;  %p1687_p3 = scmp.lt.s32.totalorder %s182_s7, %s182_s7 }
  0x11   : > { %p1620_p12 = pnand %p1627_p9, %p1619_p11  ;;  %p1680_p0 = scmp.ne.s32.totalorder %s182_s7, %s1679_s8 }
  0x12   : > { %p1688_p4 = scmp.lt.s32.totalorder %s1679_s8, %s1679_s8 }
  0x13   : > { %p1670_p13 = pneg %p1620_p12 }
  0x14   : > { %p1689_p6 = por %p1688_p4, %p1687_p3 }
  0x15   : > { %p1682_p1 = pnand %p1680_p0, %p1670_p13 }
  0x17   : > { %p1683_p2 = pneg %p1682_p1 }
  0x19   : > { %p1690_p7 = pnand %p1689_p6, %p1683_p2 }
  0x1b   : > { %1693 = shalt.err (!%p1690_p7)
}
  0x1c   : > { %s1761_s9 = smov 128   ;;  %s1762_s10 = smov 8  }
  0x1d   : > { %1622 = dma.hbm_to_vmem [thread:$0]  (!%p1620_p12), %s2209_s4, 2304, %s182_s7, [#allocation3], %s1761_s9, %s1761_s9, %s1762_s10  }
  0x1e   : > { %205 = sbr.rel (%p1846_p10) target bundleno = 615 (0x267), region = 40 }
  0x23   : > { %1737 = dma.done.wait (%p1627_p9), [#allocation3], 2304  }
  0x24   : > { %1739 = vsyncadd (%p1627_p9), [#allocation3], 4294964992  ;;  %p233_p8 = scmp.lt.s32.totalorder %s1818_s22, 1  ;;  %v1763_v0 = vmov 0.0   ;;  %v269_v1 = vld [vmem:[%s2206_s1 + $0x78] sm:$0xff]  ;;  %v268_v2 = vld [vmem:[%s2206_s1 + $0x70] sm:$0xff] }
  0x25   : > { %302 = vmatprep.subr.mxu0 %v1763_v0  ;;  %v267_v3 = vld [vmem:[%s2206_s1 + $0x68] sm:$0xff]  ;;  %v266_v4 = vld [vmem:[%s2206_s1 + $0x60] sm:$0xff]  ;;  %vm273_vm0 = vcmask 154624   ;;  %v265_v5 = vld [vmem:[%s2206_s1 + $0x58] sm:$0xff]  ;;  %vm298_vm1 = vcmask 1042432   ;;  %vm447_vm2 = vcmask 523264  }
  0x26   : > { %s234_s13 = scalar_select %p233_p8, %s1818_s22, 1  ;;  %303 = vmatpush1.msra.mxu0 %v269_v1  ;;  %v264_v7 = vld [vmem:[%s2206_s1 + $0x50] sm:$0xff]  ;;  %v263_v8 = vld [vmem:[%s2206_s1 + $0x48] sm:$0xff]  ;;  %v262_v9 = vld [vmem:[%s2206_s1 + $0x40] sm:$0xff] }
  0x27   : > { %304 = vmatprep.subr.mxu0 %v1763_v0  ;;  %v261_v10 = vld [vmem:[%s2206_s1 + $0x38] sm:$0xff]  ;;  %v260_v11 = vld [vmem:[%s2206_s1 + $0x30] sm:$0xff]  ;;  %v259_v12 = vld [vmem:[%s2206_s1 + $0x28] sm:$0xff]  ;;  %s1351_s17 = sshll.u32 %s1818_s22, 8  ;;  %s1764_s6 = smov [#allocation5]  }
  0x28   : > { %s1350_s23 = sshll.u32 %s234_s13, 7  ;;  %305 = vmatpush1.msra.mxu0 %v268_v2  ;;  %v258_v13 = vld [vmem:[%s2206_s1 + $0x20] sm:$0xff]  ;;  %v257_v14 = vld [vmem:[%s2206_s1 + $0x18] sm:$0xff]  ;;  %v256_v15 = vld [vmem:[%s2206_s1 + $0x10] sm:$0xff]  ;;  %s230_s13 = sand.u32 1, %s1750_s19  }
  0x29   : > { %s1879_s7 = scalar_lea.vmem %s2205_s0, %s1350_s23  ;;  %306 = vmatprep.subr.mxu0 %v1763_v0  ;;  %v255_v16 = vld [vmem:[%s2206_s1 + $0x8] sm:$0xff]  ;;  %v254_v17 = vld [vmem:[%s2206_s1] sm:$0xff]  ;;  %v272_v18 = vld [vmem:[%s2206_s1 + $0x90] sm:$0x7]  ;;  %s1313_s14 = sshll.u32 %s230_s13, 4 }
  0x2a   : > { %307 = vmatpush1.msra.mxu0 %v267_v3  ;;  %v239_v6 = vld [vmem:[%s1879_s7 + $0x8] sm:$0xff]  ;;  %v270_v20 = vld [vmem:[%s2206_s1 + $0x80] sm:$0xff]  ;;  %v241_v22 = vld [vmem:[%s1879_s7 + $0x18] sm:$0xff]  ;;  %s232_s15 = scalar_lea.vmem [#allocation5], %s1313_s14  ;;  %s2161_s26 = scalar_lea.hbm %s2210_s5, %s1351_s17 }
  0x2b   : > { %308 = vmatprep.subr.mxu0 %v1763_v0  ;;  %1317 = vmatprep.mubr.msk.f32.mxu0 %vm273_vm0, %v239_v6  ;;  %v271_v19 = vld [vmem:[%s2206_s1 + $0x88] sm:$0xff]  ;;  %v238_v21 = vld [vmem:[%s1879_s7] sm:$0xff]  ;;  %v240_v23 = vld [vmem:[%s1879_s7 + $0x10] sm:$0xff]  ;;  %s1233_s16 = sshll.u32 %s232_s15, 4  ;;  %s2165_s22 = scalar_lea.sflag [#allocation4], %s230_s13  ;;  %s2156_s16 = int_to_ptr.vmem [resolvable:$true] %s1233_s16 }
  0x2c   : > { %309 = vmatpush1.msra.mxu0 %v266_v4  ;;  %v243_v24 = vld [vmem:[%s1879_s7 + $0x28] sm:$0xff]  ;;  %v242_v25 = vld [vmem:[%s1879_s7 + $0x20] sm:$0xff]  ;;  %v245_v26 = vld [vmem:[%s1879_s7 + $0x38] sm:$0xff]  ;;  %s1694_s30 = scalar_lea.vmem %s2156_s16, 256  ;;  %s1698_s8 = sshll.u32 %s1764_s6, 4  ;;  %s1699_s8 = int_to_ptr.vmem [resolvable:$false] %s1698_s8 }
  0x2d   : > { %310 = vmatprep.subr.mxu0 %v1763_v0  ;;  %v244_v27 = vld [vmem:[%s1879_s7 + $0x30] sm:$0xff]  ;;  %v247_v28 = vld [vmem:[%s1879_s7 + $0x48] sm:$0xff]  ;;  %v246_v29 = vld [vmem:[%s1879_s7 + $0x40] sm:$0xff]  ;;  %p1695_p6 = scmp.ne.s32.totalorder %s2156_s16, %s1694_s30  ;;  %s1700_s9 = scalar_lea.vmem %s1699_s8, 512 }
  0x2e   : > { %311 = vmatpush1.msra.mxu0 %v265_v5  ;;  %v249_v30 = vld [vmem:[%s1879_s7 + $0x58] sm:$0xff]  ;;  %v248_v31 = vld [vmem:[%s1879_s7 + $0x50] sm:$0xff]  ;;  %v251_v32 = vld [vmem:[%s1879_s7 + $0x68] sm:$0xff]  ;;  %p1701_p11 = scmp.lt.s32.totalorder %s2156_s16, %s1699_s8  ;;  %p1702_p12 = scmp.lt.s32.totalorder %s1700_s9, %s1694_s30 }
  0x2f   : > { %312 = vmatprep.subr.mxu0 %v1763_v0  ;;  %v250_v33 = vld [vmem:[%s1879_s7 + $0x60] sm:$0xff]  ;;  %v253_v34 = vld [vmem:[%s1879_s7 + $0x78] sm:$0xff]  ;;  %v252_v35 = vld [vmem:[%s1879_s7 + $0x70] sm:$0xff]  ;;  %p1696_p9 = pnand %p1695_p6, %p1835_p5 }
  0x30   : > { %313 = vmatpush1.msra.mxu0 %v264_v7  ;;  %v445_v36 = vld [vmem:[#allocation2] sm:$0xff]  ;;  %p1703_p13 = por %p1702_p12, %p1701_p11 }
  0x31   : > { %314 = vmatprep.subr.mxu0 %v1763_v0  ;;  %1458 = vmatprep.mubr.msk.f32.mxu1 %vm447_vm2, %v445_v36  ;;  %v788_v37 = vld [vmem:[#allocation2 + $0x40] sm:$0xff]  ;;  %p1697_p10 = pneg %p1696_p9 }
  0x32   : > { %315 = vmatpush1.msra.mxu0 %v263_v8  ;;  %v1325_v51 = vld [vmem:[%s2207_s2] ss:$0 sm:$0xff] }
  0x33   : > { %316 = vmatprep.subr.mxu0 %v1763_v0  ;;  %v1326_v57 = vld [vmem:[%s2208_s3] ss:$0 sm:$0xff]  ;;  %p1704_p0 = pnand %p1703_p13, %p1697_p10 }
  0x34   : > { %317 = vmatpush1.msra.mxu0 %v262_v9 }
  0x35   : > { %318 = vmatprep.subr.mxu0 %v1763_v0 }
  0x36   : > { %319 = vmatpush1.msra.mxu0 %v261_v10 }
  0x37   : > { %320 = vmatprep.subr.mxu0 %v1763_v0 }
  0x38   : > { %321 = vmatpush1.msra.mxu0 %v260_v11 }
  0x39   : > { %322 = vmatprep.subr.mxu0 %v1763_v0 }
  0x3a   : > { %323 = vmatpush1.msra.mxu0 %v259_v12 }
  0x3b   : > { %324 = vmatprep.subr.mxu0 %v1763_v0 }
  0x3c   : > { %325 = vmatpush1.msra.mxu0 %v258_v13 }
  0x3d   : > { %326 = vmatprep.subr.mxu0 %v1763_v0 }
  0x3e   : > { %327 = vmatpush1.msra.mxu0 %v257_v14 }
  0x3f   : > { %328 = vmatprep.subr.mxu0 %v1763_v0 }
  0x40   : > { %329 = vmatpush1.msra.mxu0 %v256_v15 }
  0x41   : > { %330 = vmatprep.subr.mxu0 %v1763_v0 }
  0x42   : > { %331 = vmatpush1.msra.mxu0 %v255_v16  ;;  %v446_v16 = vld [vmem:[#allocation2 + $0x8] sm:$0xff] }
  0x43   : > { %332 = vmatprep.subr.mxu0 %v1763_v0 }
  0x44   : > { %333 = vmatpush1.msra.mxu0 %v254_v17  ;;  %v789_v17 = vld [vmem:[#allocation2 + $0x48] sm:$0xff] }
  0x45   : > { %360 = vmatprep.subr.mxu0 %v1763_v0 }
  0x46   : > { %1316 = vmatpush2.msk.msra.mxu0 %vm298_vm1, %v272_v18  ;;  %v530_v18 = vld [vmem:[#allocation2 + $0x10] sm:$0xff] }
  0x47   : > { %362 = vmatprep.subr.mxu0 %v1763_v0 }
  0x48   : > { %363 = vmatpush2.msra.mxu0 %v271_v19  ;;  %v531_v19 = vld [vmem:[#allocation2 + $0x18] sm:$0xff] }
  0x49   : > { %364 = vmatprep.subr.mxu0 %v1763_v0 }
  0x4a   : > { %365 = vmatpush2.msra.mxu0 %v270_v20  ;;  %v960_v20 = vld [vmem:[#allocation2 + $0x60] sm:$0xff] }
  0x4b   : > { %367 = vmatmul.mubr.f32.vlgmr.msra.gmra.mxu0 %v238_v21  ;;  %v961_v21 = vld [vmem:[#allocation2 + $0x68] sm:$0xff] }
  0x4c   : > { %1318 = vmatprep.mubr.msk.f32.mxu0 %vm273_vm0, %v241_v22  ;;  %v616_v22 = vld [vmem:[#allocation2 + $0x20] sm:$0xff] }
  0x4f   : > { %372 = vmatmul.mubr.f32.gmra.mxu0 %v240_v23  ;;  %v617_v23 = vld [vmem:[#allocation2 + $0x28] sm:$0xff] }
  0x50   : > { %1319 = vmatprep.mubr.msk.f32.mxu0 %vm273_vm0, %v243_v24  ;;  %v702_v24 = vld [vmem:[#allocation2 + $0x30] sm:$0xff] }
  0x53   : > { %377 = vmatmul.mubr.f32.gmra.mxu0 %v242_v25  ;;  %v1132_v25 = vld [vmem:[#allocation2 + $0x80] sm:$0xff] }
  0x54   : > { %1320 = vmatprep.mubr.msk.f32.mxu0 %vm273_vm0, %v245_v26  ;;  %v1133_v26 = vld [vmem:[#allocation2 + $0x88] sm:$0xff] }
  0x57   : > { %382 = vmatmul.mubr.f32.gmra.mxu0 %v244_v27  ;;  %v703_v27 = vld [vmem:[#allocation2 + $0x38] sm:$0xff] }
  0x58   : > { %1321 = vmatprep.mubr.msk.f32.mxu0 %vm273_vm0, %v247_v28  ;;  %v874_v28 = vld [vmem:[#allocation2 + $0x50] sm:$0xff] }
  0x5b   : > { %387 = vmatmul.mubr.f32.gmra.mxu0 %v246_v29  ;;  %v875_v29 = vld [vmem:[#allocation2 + $0x58] sm:$0xff] }
  0x5c   : > { %1322 = vmatprep.mubr.msk.f32.mxu0 %vm273_vm0, %v249_v30  ;;  %v1046_v30 = vld [vmem:[#allocation2 + $0x70] sm:$0xff] }
  0x5f   : > { %392 = vmatmul.mubr.f32.gmra.mxu0 %v248_v31  ;;  %v1047_v31 = vld [vmem:[#allocation2 + $0x78] sm:$0xff] }
  0x60   : > { %1323 = vmatprep.mubr.msk.f32.mxu0 %vm273_vm0, %v251_v32 }
  0x63   : > { %397 = vmatmul.mubr.f32.gmra.mxu0 %v250_v33 }
  0x64   : > { %1324 = vmatprep.mubr.msk.f32.mxu0 %vm273_vm0, %v253_v34 }
  0x67   : > { %402 = vmatmul.mubr.f32.gmra.mxu0 %v252_v35 }
  0x68   : > { %1534 = vmatprep.mubr.msk.f32.mxu0 %vm447_vm2, %v788_v37 }
 0x10b   : > { %v368_v38 = vpop.f32.mrf.mxu0 }
 0x10c   : > { %v414_v7 = vmul.f32 %v1325_v51, %v368_v38 }
 0x10d   : > { %v370_v39 = vpop.f32.mrf.mxu0 }
 0x10e   : > { %v429_v12 = vadd.f32 %v1326_v57, %v414_v7 }
 0x10f   : > { %v373_v40 = vpop.f32.mrf.mxu0 }
 0x110   : > { %v415_v4 = vmul.f32 %v1325_v51, %v373_v40  ;;  %v2016_v15 = vmax.f32 %v429_v12, 0.0 }
 0x111   : > { %v375_v41 = vpop.f32.mrf.mxu0 }
 0x112   : > { %v430_v10 = vadd.f32 %v1326_v57, %v415_v4 }
 0x113   : > { %v378_v42 = vpop.f32.mrf.mxu0 }
 0x114   : > { %v416_v1 = vmul.f32 %v1325_v51, %v378_v42  ;;  %v2010_v14 = vmax.f32 %v430_v10, 0.0 }
 0x115   : > { %v380_v43 = vpop.f32.mrf.mxu0 }
 0x116   : > { %v431_v8 = vadd.f32 %v1326_v57, %v416_v1 }
 0x117   : > { %v383_v44 = vpop.f32.mrf.mxu0 }
 0x118   : > { %v417_v62 = vmul.f32 %v1325_v51, %v383_v44  ;;  %v2004_v13 = vmax.f32 %v431_v8, 0.0 }
 0x119   : > { %v385_v45 = vpop.f32.mrf.mxu0 }
 0x11a   : > { %v432_v5 = vadd.f32 %v1326_v57, %v417_v62 }
 0x11b   : > { %v388_v46 = vpop.f32.mrf.mxu0 }
 0x11c   : > { %v418_v59 = vmul.f32 %v1325_v51, %v388_v46  ;;  %v1998_v11 = vmax.f32 %v432_v5, 0.0 }
 0x11d   : > { %v390_v47 = vpop.f32.mrf.mxu0 }
 0x11e   : > { %v433_v2 = vadd.f32 %v1326_v57, %v418_v59 }
 0x11f   : > { %v393_v48 = vpop.f32.mrf.mxu0 }
 0x120   : > { %v419_v55 = vmul.f32 %v1325_v51, %v393_v48  ;;  %v1992_v9 = vmax.f32 %v433_v2, 0.0 }
 0x121   : > { %v395_v49 = vpop.f32.mrf.mxu0 }
 0x122   : > { %v434_v63 = vadd.f32 %v1326_v57, %v419_v55 }
 0x123   : > { %v398_v50 = vpop.f32.mrf.mxu0 }
 0x124   : > { %v420_v53 = vmul.f32 %v1325_v51, %v398_v50  ;;  %v1986_v6 = vmax.f32 %v434_v63, 0.0 }
 0x125   : > { %v400_v52 = vpop.f32.mrf.mxu0 }
 0x126   : > { %v435_v60 = vadd.f32 %v1326_v57, %v420_v53 }
 0x127   : > { %v403_v54 = vpop.f32.mrf.mxu0 }
 0x128   : > { %v421_v56 = vmul.f32 %v1325_v51, %v403_v54  ;;  %v1980_v3 = vmax.f32 %v435_v60, 0.0 }
 0x129   : > { %v405_v58 = vpop.f32.mrf.mxu0 }
 0x12a   : > { %v436_v61 = vadd.f32 %v1326_v57, %v421_v56 }
 0x12c   : > { %v1978_v0 = vmax.f32 %v436_v61, 0.0 }
 0x12e   : > { %1442 = vmatprep.subr.mxu1 %v1978_v0  ;;  %1518 = vmatprep.subr.mxu0 %v1978_v0 }
 0x12f   : > { %1443 = vmatpush3.msra.mxu1 %v1978_v0  ;;  %1519 = vmatpush3.msra.mxu0 %v1978_v0 }
 0x130   : > { %1444 = vmatprep.subr.mxu1 %v1980_v3  ;;  %1520 = vmatprep.subr.mxu0 %v1980_v3 }
 0x131   : > { %1445 = vmatpush3.msra.mxu1 %v1980_v3  ;;  %1521 = vmatpush3.msra.mxu0 %v1980_v3 }
 0x132   : > { %1446 = vmatprep.subr.mxu1 %v1986_v6  ;;  %1522 = vmatprep.subr.mxu0 %v1986_v6 }
 0x133   : > { %1447 = vmatpush3.msra.mxu1 %v1986_v6  ;;  %1523 = vmatpush3.msra.mxu0 %v1986_v6 }
 0x134   : > { %1448 = vmatprep.subr.mxu1 %v1992_v9  ;;  %1524 = vmatprep.subr.mxu0 %v1992_v9 }
 0x135   : > { %1449 = vmatpush3.msra.mxu1 %v1992_v9  ;;  %1525 = vmatpush3.msra.mxu0 %v1992_v9 }
 0x136   : > { %1450 = vmatprep.subr.mxu1 %v1998_v11  ;;  %1526 = vmatprep.subr.mxu0 %v1998_v11 }
 0x137   : > { %1451 = vmatpush3.msra.mxu1 %v1998_v11  ;;  %1527 = vmatpush3.msra.mxu0 %v1998_v11 }
 0x138   : > { %1452 = vmatprep.subr.mxu1 %v2004_v13  ;;  %1528 = vmatprep.subr.mxu0 %v2004_v13 }
 0x139   : > { %1453 = vmatpush3.msra.mxu1 %v2004_v13  ;;  %1529 = vmatpush3.msra.mxu0 %v2004_v13 }
 0x13a   : > { %1454 = vmatprep.subr.mxu1 %v2010_v14  ;;  %1530 = vmatprep.subr.mxu0 %v2010_v14 }
 0x13b   : > { %1455 = vmatpush3.msra.mxu1 %v2010_v14  ;;  %1531 = vmatpush3.msra.mxu0 %v2010_v14 }
 0x13c   : > { %1456 = vmatprep.subr.mxu1 %v2016_v15  ;;  %1532 = vmatprep.subr.mxu0 %v2016_v15 }
 0x13d   : > { %1457 = vmatpush3.msra.mxu1 %v2016_v15  ;;  %1533 = vmatpush3.msra.mxu0 %v2016_v15 }
 0x13e   : > { %1459 = vmatmul.mubr.msk.f32.vlgmr.msra.gmra.mxu1 %vm447_vm2, %v446_v16  ;;  %1461 = vmatprep.subr.mxu1 %v1978_v0 }
 0x13f   : > { %1556 = vmatprep.subr.mxu0 %v1978_v0  ;;  %1462 = vmatpush3.msra.mxu1 %v1978_v0 }
 0x140   : > { %1535 = vmatmul.mubr.msk.f32.vlgmr.msra.gmra.mxu0 %vm447_vm2, %v789_v17  ;;  %1463 = vmatprep.subr.mxu1 %v1980_v3 }
 0x141   : > { %1557 = vmatpush3.msra.mxu0 %v1978_v0  ;;  %1464 = vmatpush3.msra.mxu1 %v1980_v3 }
 0x142   : > { %1558 = vmatprep.subr.mxu0 %v1980_v3  ;;  %1465 = vmatprep.subr.mxu1 %v1986_v6 }
 0x143   : > { %1559 = vmatpush3.msra.mxu0 %v1980_v3  ;;  %1466 = vmatpush3.msra.mxu1 %v1986_v6 }
 0x144   : > { %1560 = vmatprep.subr.mxu0 %v1986_v6  ;;  %1467 = vmatprep.subr.mxu1 %v1992_v9 }
 0x145   : > { %1561 = vmatpush3.msra.mxu0 %v1986_v6  ;;  %1468 = vmatpush3.msra.mxu1 %v1992_v9 }
 0x146   : > { %1562 = vmatprep.subr.mxu0 %v1992_v9  ;;  %1469 = vmatprep.subr.mxu1 %v1998_v11 }
 0x147   : > { %1563 = vmatpush3.msra.mxu0 %v1992_v9  ;;  %1470 = vmatpush3.msra.mxu1 %v1998_v11 }
 0x148   : > { %1564 = vmatprep.subr.mxu0 %v1998_v11  ;;  %1471 = vmatprep.subr.mxu1 %v2004_v13 }
 0x149   : > { %1565 = vmatpush3.msra.mxu0 %v1998_v11  ;;  %1472 = vmatpush3.msra.mxu1 %v2004_v13 }
 0x14a   : > { %1566 = vmatprep.subr.mxu0 %v2004_v13  ;;  %1473 = vmatprep.subr.mxu1 %v2010_v14 }
 0x14b   : > { %1567 = vmatpush3.msra.mxu0 %v2004_v13  ;;  %1474 = vmatpush3.msra.mxu1 %v2010_v14 }
 0x14c   : > { %1568 = vmatprep.subr.mxu0 %v2010_v14  ;;  %1475 = vmatprep.subr.mxu1 %v2016_v15 }
 0x14d   : > { %1569 = vmatpush3.msra.mxu0 %v2010_v14  ;;  %1476 = vmatpush3.msra.mxu1 %v2016_v15 }
 0x14e   : > { %1570 = vmatprep.subr.mxu0 %v2016_v15  ;;  %1477 = vmatprep.mubr.msk.f32.mxu1 %vm447_vm2, %v530_v18 }
 0x14f   : > { %1571 = vmatpush3.msra.mxu0 %v2016_v15  ;;  %1478 = vmatmul.mubr.msk.f32.vlgmr.msra.gmra.mxu1 %vm447_vm2, %v531_v19 }
 0x150   : > { %1480 = vmatprep.subr.mxu1 %v1978_v0  ;;  %1572 = vmatprep.mubr.msk.f32.mxu0 %vm447_vm2, %v960_v20 }
 0x151   : > { %1594 = vmatprep.subr.mxu0 %v1978_v0  ;;  %1481 = vmatpush3.msra.mxu1 %v1978_v0 }
 0x152   : > { %1573 = vmatmul.mubr.msk.f32.vlgmr.msra.gmra.mxu0 %vm447_vm2, %v961_v21  ;;  %1482 = vmatprep.subr.mxu1 %v1980_v3 }
 0x153   : > { %1595 = vmatpush3.msra.mxu0 %v1978_v0  ;;  %1483 = vmatpush3.msra.mxu1 %v1980_v3 }
 0x154   : > { %1596 = vmatprep.subr.mxu0 %v1980_v3  ;;  %1484 = vmatprep.subr.mxu1 %v1986_v6 }
 0x155   : > { %1597 = vmatpush3.msra.mxu0 %v1980_v3  ;;  %1485 = vmatpush3.msra.mxu1 %v1986_v6 }
 0x156   : > { %1598 = vmatprep.subr.mxu0 %v1986_v6  ;;  %1486 = vmatprep.subr.mxu1 %v1992_v9 }
 0x157   : > { %1599 = vmatpush3.msra.mxu0 %v1986_v6  ;;  %1487 = vmatpush3.msra.mxu1 %v1992_v9 }
 0x158   : > { %1600 = vmatprep.subr.mxu0 %v1992_v9  ;;  %1488 = vmatprep.subr.mxu1 %v1998_v11 }
 0x159   : > { %1601 = vmatpush3.msra.mxu0 %v1992_v9  ;;  %1489 = vmatpush3.msra.mxu1 %v1998_v11 }
 0x15a   : > { %1602 = vmatprep.subr.mxu0 %v1998_v11  ;;  %1490 = vmatprep.subr.mxu1 %v2004_v13 }
 0x15b   : > { %1603 = vmatpush3.msra.mxu0 %v1998_v11  ;;  %1491 = vmatpush3.msra.mxu1 %v2004_v13 }
 0x15c   : > { %1604 = vmatprep.subr.mxu0 %v2004_v13  ;;  %1492 = vmatprep.subr.mxu1 %v2010_v14 }
 0x15d   : > { %1605 = vmatpush3.msra.mxu0 %v2004_v13  ;;  %1493 = vmatpush3.msra.mxu1 %v2010_v14 }
 0x15e   : > { %1606 = vmatprep.subr.mxu0 %v2010_v14  ;;  %1494 = vmatprep.subr.mxu1 %v2016_v15 }
 0x15f   : > { %1607 = vmatpush3.msra.mxu0 %v2010_v14  ;;  %1495 = vmatpush3.msra.mxu1 %v2016_v15 }
 0x160   : > { %1608 = vmatprep.subr.mxu0 %v2016_v15  ;;  %1496 = vmatprep.mubr.msk.f32.mxu1 %vm447_vm2, %v616_v22 }
 0x161   : > { %1609 = vmatpush3.msra.mxu0 %v2016_v15  ;;  %1497 = vmatmul.mubr.msk.f32.vlgmr.msra.gmra.mxu1 %vm447_vm2, %v617_v23 }
 0x162   : > { %1499 = vmatprep.subr.mxu1 %v1978_v0  ;;  %1515 = vmatprep.mubr.msk.f32.mxu1 %vm447_vm2, %v702_v24 }
 0x163   : > { %1500 = vmatpush3.msra.mxu1 %v1978_v0  ;;  %1610 = vmatprep.mubr.msk.f32.mxu0 %vm447_vm2, %v1132_v25 }
 0x164   : > { %1501 = vmatprep.subr.mxu1 %v1980_v3  ;;  %1611 = vmatmul.mubr.msk.f32.vlgmr.msra.gmra.mxu0 %vm447_vm2, %v1133_v26 }
 0x165   : > { %1502 = vmatpush3.msra.mxu1 %v1980_v3 }
 0x166   : > { %1503 = vmatprep.subr.mxu1 %v1986_v6 }
 0x167   : > { %1504 = vmatpush3.msra.mxu1 %v1986_v6 }
 0x168   : > { %1505 = vmatprep.subr.mxu1 %v1992_v9 }
 0x169   : > { %1506 = vmatpush3.msra.mxu1 %v1992_v9 }
 0x16a   : > { %1507 = vmatprep.subr.mxu1 %v1998_v11 }
 0x16b   : > { %1508 = vmatpush3.msra.mxu1 %v1998_v11 }
 0x16c   : > { %1509 = vmatprep.subr.mxu1 %v2004_v13 }
 0x16d   : > { %1510 = vmatpush3.msra.mxu1 %v2004_v13 }
 0x16e   : > { %1511 = vmatprep.subr.mxu1 %v2010_v14 }
 0x16f   : > { %1512 = vmatpush3.msra.mxu1 %v2010_v14 }
 0x170   : > { %1513 = vmatprep.subr.mxu1 %v2016_v15 }
 0x171   : > { %1514 = vmatpush3.msra.mxu1 %v2016_v15 }
 0x172   : > { %1516 = vmatmul.mubr.msk.f32.vlgmr.msra.gmra.mxu1 %vm447_vm2, %v703_v27  ;;  %1537 = vmatprep.subr.mxu1 %v1978_v0 }
 0x173   : > { %1538 = vmatpush3.msra.mxu1 %v1978_v0  ;;  %1553 = vmatprep.mubr.msk.f32.mxu1 %vm447_vm2, %v874_v28 }
 0x174   : > { %1539 = vmatprep.subr.mxu1 %v1980_v3 }
 0x175   : > { %1540 = vmatpush3.msra.mxu1 %v1980_v3 }
 0x176   : > { %1541 = vmatprep.subr.mxu1 %v1986_v6 }
 0x177   : > { %1542 = vmatpush3.msra.mxu1 %v1986_v6 }
 0x178   : > { %1543 = vmatprep.subr.mxu1 %v1992_v9 }
 0x179   : > { %1544 = vmatpush3.msra.mxu1 %v1992_v9 }
 0x17a   : > { %1545 = vmatprep.subr.mxu1 %v1998_v11 }
 0x17b   : > { %1546 = vmatpush3.msra.mxu1 %v1998_v11 }
 0x17c   : > { %1547 = vmatprep.subr.mxu1 %v2004_v13 }
 0x17d   : > { %1548 = vmatpush3.msra.mxu1 %v2004_v13 }
 0x17e   : > { %1549 = vmatprep.subr.mxu1 %v2010_v14 }
 0x17f   : > { %1550 = vmatpush3.msra.mxu1 %v2010_v14 }
 0x180   : > { %1551 = vmatprep.subr.mxu1 %v2016_v15 }
 0x181   : > { %1552 = vmatpush3.msra.mxu1 %v2016_v15 }
 0x182   : > { %1554 = vmatmul.mubr.msk.f32.vlgmr.msra.gmra.mxu1 %vm447_vm2, %v875_v29  ;;  %1575 = vmatprep.subr.mxu1 %v1978_v0 }
 0x183   : > { %1576 = vmatpush3.msra.mxu1 %v1978_v0  ;;  %1591 = vmatprep.mubr.msk.f32.mxu1 %vm447_vm2, %v1046_v30 }
 0x184   : > { %1577 = vmatprep.subr.mxu1 %v1980_v3 }
 0x185   : > { %1578 = vmatpush3.msra.mxu1 %v1980_v3 }
 0x186   : > { %1579 = vmatprep.subr.mxu1 %v1986_v6 }
 0x187   : > { %1580 = vmatpush3.msra.mxu1 %v1986_v6 }
 0x188   : > { %1581 = vmatprep.subr.mxu1 %v1992_v9 }
 0x189   : > { %1582 = vmatpush3.msra.mxu1 %v1992_v9 }
 0x18a   : > { %1583 = vmatprep.subr.mxu1 %v1998_v11 }
 0x18b   : > { %1584 = vmatpush3.msra.mxu1 %v1998_v11 }
 0x18c   : > { %1585 = vmatprep.subr.mxu1 %v2004_v13 }
 0x18d   : > { %1586 = vmatpush3.msra.mxu1 %v2004_v13 }
 0x18e   : > { %1587 = vmatprep.subr.mxu1 %v2010_v14 }
 0x18f   : > { %1588 = vmatpush3.msra.mxu1 %v2010_v14 }
 0x190   : > { %1589 = vmatprep.subr.mxu1 %v2016_v15 }
 0x191   : > { %1590 = vmatpush3.msra.mxu1 %v2016_v15 }
 0x192   : > { %1592 = vmatmul.mubr.msk.f32.vlgmr.msra.gmra.mxu1 %vm447_vm2, %v1047_v31 }
 0x1fe   : > { %v1460_v32 = vpop.f32.mrf.mxu1 }
 0x200   : > { %v520_v33 = vpop.f32.mrf.mxu1  ;;  %v1536_v42 = vpop.f32.mrf.mxu0 }
 0x202   : > { %v862_v48 = vpop.f32.mrf.mxu0 }
 0x20f   : > { %v1479_v34 = vpop.f32.mrf.mxu1 }
 0x210   : > { %v614_v39 = vmax.f32 %v1460_v32, %v1479_v34 }
 0x211   : > { %v604_v35 = vpop.f32.mrf.mxu1 }
 0x212   : > { %v613_v40 = vmax.f32 %v520_v33, %v604_v35  ;;  %v1574_v50 = vpop.f32.mrf.mxu0 }
 0x214   : > { %v1034_v55 = vpop.f32.mrf.mxu0 }
 0x221   : > { %v1498_v36 = vpop.f32.mrf.mxu1 }
 0x222   : > { %v700_v41 = vmax.f32 %v614_v39, %v1498_v36 }
 0x223   : > { %v690_v37 = vpop.f32.mrf.mxu1 }
 0x224   : > { %v699_v44 = vmax.f32 %v613_v40, %v690_v37  ;;  %v1612_v58 = vpop.f32.mrf.mxu0 }
 0x226   : > { %v1206_v0 = vpop.f32.mrf.mxu0 }
 0x232   : > { %v1517_v38 = vpop.f32.mrf.mxu1 }
 0x233   : > { %v786_v45 = vmax.f32 %v700_v41, %v1517_v38 }
 0x234   : > { %v776_v43 = vpop.f32.mrf.mxu1 }
 0x235   : > { %v785_v47 = vmax.f32 %v699_v44, %v776_v43  ;;  %v872_v49 = vmax.f32 %v786_v45, %v1536_v42 }
 0x237   : > { %v871_v52 = vmax.f32 %v785_v47, %v862_v48 }
 0x242   : > { %v1555_v46 = vpop.f32.mrf.mxu1 }
 0x243   : > { %v958_v53 = vmax.f32 %v872_v49, %v1555_v46 }
 0x244   : > { %v948_v51 = vpop.f32.mrf.mxu1 }
 0x245   : > { %v957_v54 = vmax.f32 %v871_v52, %v948_v51  ;;  %v1044_v56 = vmax.f32 %v958_v53, %v1574_v50 }
 0x247   : > { %v1043_v59 = vmax.f32 %v957_v54, %v1034_v55 }
 0x252   : > { %v1593_v57 = vpop.f32.mrf.mxu1 }
 0x253   : > { %v1130_v60 = vmax.f32 %v1044_v56, %v1593_v57 }
 0x254   : > { %v1120_v61 = vpop.f32.mrf.mxu1 }
 0x255   : > { %v1216_v62 = vmax.f32 %v1130_v60, %v1612_v58  ;;  %v1129_v63 = vmax.f32 %v1043_v59, %v1120_v61 }
 0x257   : > { %1218 = vst.msk [vmem:[%s232_s15 + $0x8] sm:$0xff] %vm447_vm2, %v1216_v62  ;;  %v1215_v1 = vmax.f32 %v1129_v63, %v1206_v0 }
 0x259   : > { %1217 = vst.msk [vmem:[%s232_s15] sm:$0xff] %vm447_vm2, %v1215_v1 }
 0x25a   : > { %1707 = shalt.err (!%p1704_p0)
}
 0x25b   : > { %s1708_s7 = scalar_lea.hbm %s2161_s26, 256  ;;  %s1712_s12 = scalar_lea.hbm %s2210_s5, 512 }
 0x25c   : > { %p1709_p1 = scmp.ne.s32.totalorder %s2161_s26, %s1708_s7  ;;  %p1713_p4 = scmp.lt.s32.totalorder %s2161_s26, %s2210_s5 }
 0x25d   : > { %p1714_p7 = scmp.lt.s32.totalorder %s1712_s12, %s1708_s7 }
 0x25e   : > { %p1710_p2 = pnand %p1709_p1, %p1835_p5 }
 0x25f   : > { %p1715_p8 = por %p1714_p7, %p1713_p4 }
 0x260   : > { %p1711_p3 = pneg %p1710_p2 }
 0x262   : > { %p1716_p6 = pnand %p1715_p8, %p1711_p3 }
 0x264   : > { %1719 = shalt.err (!%p1716_p6)
}
 0x265   : > { %s1765_s15 = smov 128   ;;  %s1766_s17 = smov 8  }
 0x266   : > { %1617 = dma.vmem_to_hbm [thread:$0]  (%p1835_p5), %s2156_s16, 256, %s2161_s26, %s2165_s22, %s1765_s15, %s1765_s15, %s1766_s17  }
 0x267 PF: > { %p1629_p9 = scmp.ge.s32.totalorder %s1758_s21, 2  ;;  %s1248_s23 = sand.u32 1, %s1746_s18  }
 0x268   : > { %p2214_p10 = scmp.ne.s32.totalorder %s2212_s29, 0  ;;  %s1249_s25 = scalar_lea.sflag [#allocation4], %s1248_s23 }
 0x26a   : > { %p1624_p11 = pnand %p1629_p9, %p2214_p10 }
 0x26c   : > { %p1625_p12 = pneg %p1624_p11 }
 0x26e   : > { %1741 = dma.done.wait (%p1625_p12), %s1249_s25, 256  }
 0x26f   : > { %1743 = vsyncadd (%p1625_p12), %s1249_s25, 4294967040  ;;  %p16_p13 = scmp.ge.s32.totalorder %s1822_s24, 4   ;;  %s2215_s18 = smov %s1750_s19 }
 0x270   : > { %s2216_s19 = smov %s1754_s20  ;;  %s2217_s20 = smov %s1833_s27 }
 0x271   : > { %s2218_s21 = smov %s1822_s24  ;;  %18 = sbr.rel (!%p16_p13) target bundleno = 4 (0x4), region = 88 }
 0x276   :  { %1254 = vsyncpa [#allocation3], 1 }
 0x277   :  { %1256 = vsyncpa [#allocation3 + $0x1], 1 }
 0x278   :  { %1257 = vsyncpa [#allocation4], 1 }
 0x279   :  { %1259 = vsyncpa [#allocation4 + $0x1], 1 }

</bundles_post_ra>
